<compile_context>
chip_gen: v5e
topology: v5e:2x2
jax: 0.10.0
libtpu: 0.0.40
codegen_flags: <defaults>
</compile_context>

<pallas_src>
import jax
import jax.numpy as jnp
from jax.experimental import pallas as pl
from jax.experimental.pallas import tpu as pltpu


def _round_up(x, m):
    return ((x + m - 1) // m) * m


def _resident_spec(shape):
    """Constant-index (VMEM-resident) BlockSpec; single-buffered if supported."""
    idx = lambda i: (0, 0)
    try:
        return pl.BlockSpec(shape, idx, pipeline_mode=pl.Buffered(1))
    except (AttributeError, TypeError):
        return pl.BlockSpec(shape, idx)


def _mlp_kernel(x_ref, w1_ref, b_ref, w2_ref, o_ref):
    # x_ref : (TILE_B, IN)     f32 (or bf16) -- cast to bf16 in-kernel
    # w1_ref: (IN, Hp)         bf16
    # b_ref : (1, Hp + Op)     f32  (b1 | b2, zero-padded)
    # w2_ref: (Hp, Op)         bf16
    # o_ref : (TILE_B, Op)     final dtype (x.dtype)
    hid = w1_ref.shape[1]

    # fc1: bf16 MXU matmul, f32 accumulation; bias + ReLU stay in f32.
    x_bf16 = x_ref[...].astype(jnp.bfloat16)
    h = jnp.dot(x_bf16, w1_ref[...], preferred_element_type=jnp.float32)
    h = jnp.maximum(h + b_ref[:, :hid], 0.0)        # (1, Hp) bias broadcasts

    # fc2: cast activations to bf16 only at the MXU input, accumulate in f32.
    out = jnp.dot(h.astype(w2_ref.dtype), w2_ref[...],
                  preferred_element_type=jnp.float32)
    out = out + b_ref[:, hid:]                       # (1, Op)
    o_ref[...] = out.astype(o_ref.dtype)


def two_layer_nn(x, w1, b1, w2, b2, *, max_tile_b=256, lane=128):
    """x: (B, IN), w1: (IN, HID), b1: (HID,), w2: (HID, OUT), b2: (OUT,).

    Same math as torch: relu(x @ W1 + b1) @ W2 + b2  (W stored transposed
    relative to nn.Linear's (out, in) layout).
    """
    B, IN = x.shape
    HID = w1.shape[1]
    OUT = w2.shape[1]

    # Lane-dense padded widths for the hidden / output dims.
    Hp = _round_up(HID, lane)
    Op = _round_up(OUT, lane)

    # Batch tile: single exact tile for tiny B; otherwise >= 2 tiles (so the
    # "parallel" batch axis can shard across v7x's 2 TensorCores), multiple of
    # 8 sublanes, capped by max_tile_b / VMEM.
    if B <= 16:
        tile_b = B                                   # block == full dim, exact
    else:
        tile_b = min(max_tile_b, _round_up(pl.cdiv(B, 2), 8))
    grid = (pl.cdiv(B, tile_b),)

    # bf16 weights, zero-padded (exact math: padded hidden units / output
    # columns are identically zero and sliced off at the end).
    w1p = jnp.zeros((IN, Hp), jnp.bfloat16).at[:, :HID].set(w1.astype(jnp.bfloat16))
    w2p = jnp.zeros((Hp, Op), jnp.bfloat16).at[:HID, :OUT].set(w2.astype(jnp.bfloat16))

    # Pack both biases into one f32 row: [b1 (padded to Hp) | b2 (padded to Op)].
    b = jnp.zeros((1, Hp + Op), jnp.float32)
    b = b.at[0, :HID].set(b1.astype(jnp.float32))
    b = b.at[0, Hp:Hp + OUT].set(b2.astype(jnp.float32))

    out_dtype = x.dtype
    out_itemsize = jnp.dtype(out_dtype).itemsize
    x_itemsize = jnp.dtype(x.dtype).itemsize

    # VMEM budget: resident weights (single-buffered) + double-buffered x/out
    # streams + f32 intermediates slack; clamp to [16 MiB, 64 MiB] (v7x phys).
    resident_bytes = IN * Hp * 2 + Hp * Op * 2 + (Hp + Op) * 4
    stream_bytes = 2 * tile_b * IN * x_itemsize + 2 * tile_b * Op * out_itemsize
    scratch_bytes = tile_b * (Hp + Op) * 4
    vmem_limit = int(min(max(2 * (resident_bytes + stream_bytes + scratch_bytes),
                             16 * 1024 * 1024),
                         64 * 1024 * 1024))

    flops = 2 * B * (IN * Hp + Hp * Op)
    bytes_accessed = (B * IN * x_itemsize + IN * Hp * 2 + Hp * Op * 2
                      + (Hp + Op) * 4 + B * Op * out_itemsize)

    out_p = pl.pallas_call(
        _mlp_kernel,
        out_shape=jax.ShapeDtypeStruct((B, Op), out_dtype),
        grid=grid,
        in_specs=[
            pl.BlockSpec((tile_b, IN), lambda i: (i, 0)),   # x: streamed over batch
            _resident_spec((IN, Hp)),                        # W1: resident, 1-buffered
            _resident_spec((1, Hp + Op)),                    # packed biases: resident
            _resident_spec((Hp, Op)),                        # W2: resident, 1-buffered
        ],
        out_specs=pl.BlockSpec((tile_b, Op), lambda i: (i, 0)),
        compiler_params=pltpu.CompilerParams(
            dimension_semantics=("parallel",),               # shard batch tiles on v7x
            vmem_limit_bytes=vmem_limit,
        ),
        cost_estimate=pl.CostEstimate(
            flops=flops, transcendentals=0, bytes_accessed=bytes_accessed),
    )(x, w1p, b, w2p)

    return out_p[:, :OUT]


if __name__ == "__main__":
    # Shapes consistent with TwoLayerNN(input_size, hidden_size, output_size)
    B, IN, HID, OUT = 8, 32, 64, 16

    key = jax.random.PRNGKey(0)
    kx, kw1, kb1, kw2, kb2 = jax.random.split(key, 5)

    x = jax.random.normal(kx, (B, IN), dtype=jnp.float32)
    # Deterministic init mimicking nn.Linear's uniform(-1/sqrt(fan_in), +...)
    lim1 = 1.0 / (IN ** 0.5)
    lim2 = 1.0 / (HID ** 0.5)
    w1 = jax.random.uniform(kw1, (IN, HID), jnp.float32, -lim1, lim1)
    b1 = jax.random.uniform(kb1, (HID,), jnp.float32, -lim1, lim1)
    w2 = jax.random.uniform(kw2, (HID, OUT), jnp.float32, -lim2, lim2)
    b2 = jax.random.uniform(kb2, (OUT,), jnp.float32, -lim2, lim2)

    out = jax.jit(two_layer_nn)(x, w1, b1, w2, b2)
    jax.block_until_ready(out)

    # Reference check in plain f32 JAX (same math as the PyTorch module).
    # Tolerance loosened because the kernel uses bf16 MXU inputs w/ f32 accum.
    ref = jnp.maximum(x @ w1 + b1, 0.0) @ w2 + b2
    assert out.shape == (B, OUT)
    assert out.dtype == x.dtype
    assert jnp.allclose(out, ref, atol=5e-2, rtol=5e-2), (
        float(jnp.max(jnp.abs(out - ref))))

    print("KERNEL_OK")
</pallas_src>

<mosaic_0001>
module attributes {stable_mosaic.version = 11 : i64} {
  func.func @_mlp_kernel(%arg0: i32, %arg1: memref<8x32xf32, #tpu.memory_space<vmem>>, %arg2: memref<32x128xbf16, #tpu.memory_space<vmem>>, %arg3: memref<1x256xf32, #tpu.memory_space<vmem>>, %arg4: memref<128x128xbf16, #tpu.memory_space<vmem>>, %arg5: memref<8x128xf32, #tpu.memory_space<vmem>>) attributes {dimension_semantics = [#tpu.dimension_semantics<parallel>], iteration_bounds = array<i64: 1>, scalar_prefetch = 0 : i64, scratch_operands = 0 : i64, tpu.core_type = #tpu.core_type<tc>, window_params = [{transform_indices = @transform_0, window_bounds = array<i64: 8, 32>}, {pipeline_mode = #tpu.pipeline_mode<synchronous>, transform_indices = @transform_1, window_bounds = array<i64: 32, 128>}, {pipeline_mode = #tpu.pipeline_mode<synchronous>, transform_indices = @transform_2, window_bounds = array<i64: 1, 256>}, {pipeline_mode = #tpu.pipeline_mode<synchronous>, transform_indices = @transform_3, window_bounds = array<i64: 128, 128>}, {transform_indices = @transform_4, window_bounds = array<i64: 8, 128>}]} {
    %c0 = arith.constant 0 : index
    %c0_0 = arith.constant 0 : index
    %0 = vector.load %arg1[%c0, %c0_0] : memref<8x32xf32, #tpu.memory_space<vmem>>, vector<8x32xf32>
    %1 = arith.truncf %0 : vector<8x32xf32> to vector<8x32xbf16>
    %c0_1 = arith.constant 0 : index
    %c0_2 = arith.constant 0 : index
    %2 = vector.load %arg2[%c0_1, %c0_2] : memref<32x128xbf16, #tpu.memory_space<vmem>>, vector<32x128xbf16>
    %cst = arith.constant dense<0.000000e+00> : vector<8x128xf32>
    %3 = tpu.matmul %1, %2, %cst {dimension_numbers = #tpu.dot_dimension_numbers<[1], [0], [0], [1], [0, 0, 1, 1], [], []>} : vector<8x32xbf16>, vector<32x128xbf16>, vector<8x128xf32> -> vector<8x128xf32>
    %c0_3 = arith.constant 0 : index
    %c0_4 = arith.constant 0 : index
    %4 = vector.load %arg3[%c0_3, %c0_4] : memref<1x256xf32, #tpu.memory_space<vmem>>, vector<1x128xf32>
    %5 = vector.broadcast %4 : vector<1x128xf32> to vector<8x128xf32>
    %6 = arith.addf %3, %5 : vector<8x128xf32>
    %cst_5 = arith.constant 0.000000e+00 : f32
    %7 = vector.broadcast %cst_5 : f32 to vector<8x128xf32>
    %8 = arith.maximumf %6, %7 : vector<8x128xf32>
    %9 = arith.truncf %8 : vector<8x128xf32> to vector<8x128xbf16>
    %c0_6 = arith.constant 0 : index
    %c0_7 = arith.constant 0 : index
    %10 = vector.load %arg4[%c0_6, %c0_7] : memref<128x128xbf16, #tpu.memory_space<vmem>>, vector<128x128xbf16>
    %cst_8 = arith.constant dense<0.000000e+00> : vector<8x128xf32>
    %11 = tpu.matmul %9, %10, %cst_8 {dimension_numbers = #tpu.dot_dimension_numbers<[1], [0], [0], [1], [0, 0, 1, 1], [], []>} : vector<8x128xbf16>, vector<128x128xbf16>, vector<8x128xf32> -> vector<8x128xf32>
    %c0_9 = arith.constant 0 : index
    %c128 = arith.constant 128 : index
    %12 = vector.load %arg3[%c0_9, %c128] : memref<1x256xf32, #tpu.memory_space<vmem>>, vector<1x128xf32>
    %13 = vector.broadcast %12 : vector<1x128xf32> to vector<8x128xf32>
    %14 = arith.addf %11, %13 : vector<8x128xf32>
    %c0_10 = arith.constant 0 : index
    %c0_11 = arith.constant 0 : index
    %15 = vector.load %arg5[%c0_10, %c0_11] : memref<8x128xf32, #tpu.memory_space<vmem>>, vector<8x128xf32>
    tpu.vector_store %arg5[%c0_10, %c0_11], %14 {strides = array<i32>} : memref<8x128xf32, #tpu.memory_space<vmem>>, vector<8x128xf32>,
    return
  }
  func.func @transform_0(%arg0: i32) -> (i32, i32) {
    %c0_i32 = arith.constant 0 : i32
    %c0_i32_0 = arith.constant 0 : i32
    return %arg0, %c0_i32 : i32, i32
  }
  func.func @transform_1(%arg0: i32) -> (i32, i32) {
    %c0_i32 = arith.constant 0 : i32
    %c0_i32_0 = arith.constant 0 : i32
    %c0_i32_1 = arith.constant 0 : i32
    return %c0_i32, %c0_i32_0 : i32, i32
  }
  func.func @transform_2(%arg0: i32) -> (i32, i32) {
    %c0_i32 = arith.constant 0 : i32
    %c0_i32_0 = arith.constant 0 : i32
    %c0_i32_1 = arith.constant 0 : i32
    return %c0_i32, %c0_i32_0 : i32, i32
  }
  func.func @transform_3(%arg0: i32) -> (i32, i32) {
    %c0_i32 = arith.constant 0 : i32
    %c0_i32_0 = arith.constant 0 : i32
    %c0_i32_1 = arith.constant 0 : i32
    return %c0_i32, %c0_i32_0 : i32, i32
  }
  func.func @transform_4(%arg0: i32) -> (i32, i32) {
    %c0_i32 = arith.constant 0 : i32
    %c0_i32_0 = arith.constant 0 : i32
    return %arg0, %c0_i32 : i32, i32
  }
}

</mosaic_0001>

<bundles_post_ra>
// kernel: two_layer_nn.1
= control target key start
LH: loop header
LB: loop body
LE: loop exit
PB: predicated region body
PF: predicated region fallthrough
CT: control target
= control target key end

     0   :  { %s306_s0 = inlined_call_operand.vmem [shape: f32[8,32], index: 0, kind: input, shape index: {}]   ;;  %s307_s1 = inlined_call_operand.vmem [shape: bf16[32,128], index: 1, kind: input, shape index: {}]   ;;  %s308_s2 = inlined_call_operand.vmem [shape: f32[1,256], index: 2, kind: input, shape index: {}]   ;;  %s309_s3 = inlined_call_operand.vmem [shape: bf16[128,128], index: 3, kind: input, shape index: {}]   ;;  %s310_s4 = inlined_call_operand.hbm [shape: f32[8,128], index: 4, kind: output, shape index: {}]  }
   0x1   :  { %v200_v0 = vld [vmem:[%s307_s1 + $0x8] sm:$0xff]  ;;  %v208_v1 = vld [vmem:[%s309_s3 + $0x38] sm:$0xff]  ;;  %v199_v2 = vld [vmem:[%s307_s1] sm:$0xff] }
   0x2   :  { %51 = vmatpush.bf16.msra.mxu0 %v200_v0  ;;  %v19_v3 = vld [vmem:[%s306_s0] sm:$0xff]  ;;  %128 = vmatpush.bf16.msra.mxu1 %v208_v1  ;;  %v207_v4 = vld [vmem:[%s309_s3 + $0x30] sm:$0xff] }
   0x3   :  { %9 = vsyncpa [#allocation3], 0  ;;  %v20_v5 = vpack.c.bf16 %v19_v3, %v19_v3  ;;  %vm41_vm0 = vcmask 261120   ;;  %v206_v6 = vld [vmem:[%s309_s3 + $0x28] sm:$0xff]  ;;  %v205_v7 = vld [vmem:[%s309_s3 + $0x20] sm:$0xff]  ;;  %s238_s13 = smov [#allocation2]  }
   0x4   :  { %v204_v8 = vld [vmem:[%s309_s3 + $0x18] sm:$0xff]  ;;  %v203_v9 = vld [vmem:[%s309_s3 + $0x10] sm:$0xff]  ;;  %v202_v10 = vld [vmem:[%s309_s3 + $0x8] sm:$0xff]  ;;  %s147_s14 = sshll.u32 %s238_s13, 4  ;;  %s148_s14 = int_to_ptr.vmem [resolvable:$true] %s147_s14 }
   0x5   :  { %v201_v11 = vld [vmem:[%s309_s3] sm:$0xff]  ;;  %s149_s3 = sshll.u32 %s310_s4, 4  ;;  %s150_s3 = int_to_ptr.hbm [resolvable:$true] %s149_s3 }
   0x6   :  { %52 = vmatpush.bf16.msra.mxu0 %v199_v2  ;;  %129 = vmatpush.bf16.msra.mxu1 %v207_v4  ;;  %v210_v12 = vld [vmem:[%s308_s2] ss:$0 sm:$0xff]  ;;  %v211_v18 = vld [vmem:[%s308_s2 + $0x1] ss:$0 sm:$0xff] }
   0x9   :  { %166 = vmatmul.msk.bf16.vlgmr.msra.gmra.mxu0 %vm41_vm0, %v20_v5 }
   0xa   :  { %130 = vmatpush.bf16.msra.mxu1 %v206_v6 }
   0xe   :  { %131 = vmatpush.bf16.msra.mxu1 %v205_v7 }
  0x12   :  { %132 = vmatpush.bf16.msra.mxu1 %v204_v8 }
  0x16   :  { %133 = vmatpush.bf16.msra.mxu1 %v203_v9 }
  0x1a   :  { %134 = vmatpush.bf16.msra.mxu1 %v202_v10 }
  0x1e   :  { %135 = vmatpush.bf16.msra.mxu1 %v201_v11 }
  0x86   :  { %v54_v13 = vpop.f32.mrf.mxu0 }
  0x87   :  { %v55_v14 = vadd.f32 %v210_v12, %v54_v13 }
  0x89   :  { %v58_v15 = vmax.f32 %v55_v14, 0.0 }
  0x8b   :  { %v59_v16 = vpack.c.bf16 %v58_v15, %v58_v15 }
  0x8d   :  { %136 = vmatmul.bf16.vlgmr.msra.gmra.mxu1 %v59_v16 }
  0x8e   :  { %v56_v17 = vpop.f32.mrf.mxu0 }
 0x10a   :  { %v137_v19 = vpop.f32.mrf.mxu1 }
 0x10b   :  { %v138_v20 = vadd.f32 %v211_v18, %v137_v19 }
 0x10d   :  { %141 = vst [vmem:[#allocation2] sm:$0xff] %v138_v20 }
 0x10e   :  { %152 = dma.vmem_to_hbm [thread:$0]  %s148_s14, 128, %s150_s3, [#allocation3]  }
 0x112   :  { %v139_v21 = vpop.f32.mrf.mxu1 }
 0x113   :  { %236 = dma.done.wait [#allocation3], 128  }
 0x114   :  { %237 = vsyncadd [#allocation3], 4294967168 }
 0x115   :  { %157 = vsyncpa [#allocation3], 1 }

</bundles_post_ra>
